<compile_context>
chip_gen: v5e
topology: v5e:2x2
jax: 0.10.0
libtpu: 0.0.40
codegen_flags: <defaults>
</compile_context>

<pallas_src>
import jax
import jax.numpy as jnp
from jax.experimental import pallas as pl
from jax.experimental.pallas import tpu as pltpu


def _weightdist_kernel(x_ref, w1_ref, w2_ref, w3_ref, out_ref):
    # x_ref  : (1, C_in, T)          channel-major pixel tile (T pixels on lanes)
    # w1_ref : (de_hidden, C_in)     Conv2d 1x1 weight, native (C_out, C_in) layout
    # w2_ref : (de_hidden, de_hidden)
    # w3_ref : (C_out, de_hidden)
    # out_ref: (1, C_out, T)         tanh output tile, lane-dense store
    x = x_ref[0]
    h1 = jnp.maximum(
        jnp.dot(w1_ref[...], x, preferred_element_type=jnp.float32), 0.0)
    h2 = jnp.maximum(
        jnp.dot(w2_ref[...], h1, preferred_element_type=jnp.float32), 0.0)
    out_ref[0] = jnp.tanh(
        jnp.dot(w3_ref[...], h2, preferred_element_type=jnp.float32))


def weight_dist_forward(latents, w1, w2, w3, *, tile_hw=2048):
    """Replicates WeightDist.forward.

    latents: (N, C_in, H, W) float32
    w1: (de_hidden, C_in)       -- Conv2d(in_channels, de_hidden, 1) weight (squeezed)
    w2: (de_hidden, de_hidden)
    w3: (C_out, de_hidden)      -- C_out = (hidden+1)*out_channels + 1
    returns: (N, C_out, H, W) float32
    """
    n, c_in, h, w = latents.shape
    de_hidden = w1.shape[0]
    assert w1.shape == (de_hidden, c_in)
    assert w2.shape == (de_hidden, de_hidden)
    c_out = w3.shape[0]
    assert w3.shape == (c_out, de_hidden)

    hw = h * w
    # NCHW -> (N, C_in, H*W) is a free reshape: no transpose pass.
    x = latents.reshape(n, c_in, hw).astype(jnp.float32)

    # Pixel tile: multiple of 128 lanes, clipped to the (128-padded) pixel count.
    hw_pad = pl.cdiv(hw, 128) * 128
    t = min(int(tile_hw), hw_pad)
    t = pl.cdiv(t, 128) * 128
    hw_pad = pl.cdiv(hw, t) * t

    if hw_pad != hw:
        # Zero pixel columns are harmless (relu(0)=0, tanh(0)=0) and sliced off.
        x = jnp.pad(x, ((0, 0), (0, 0), (0, hw_pad - hw)))

    w1_f = w1.astype(jnp.float32)
    w2_f = w2.astype(jnp.float32)
    w3_f = w3.astype(jnp.float32)

    grid = (n, hw_pad // t)

    y = pl.pallas_call(
        _weightdist_kernel,
        out_shape=jax.ShapeDtypeStruct((n, c_out, hw_pad), jnp.float32),
        grid_spec=pltpu.PrefetchScalarGridSpec(
            num_scalar_prefetch=0,
            grid=grid,
            in_specs=[
                pl.BlockSpec((1, c_in, t), lambda b, j: (b, 0, j)),
                # Weights: constant block index -> resident across all steps.
                pl.BlockSpec((de_hidden, c_in), lambda b, j: (0, 0)),
                pl.BlockSpec((de_hidden, de_hidden), lambda b, j: (0, 0)),
                pl.BlockSpec((c_out, de_hidden), lambda b, j: (0, 0)),
            ],
            out_specs=pl.BlockSpec((1, c_out, t), lambda b, j: (b, 0, j)),
        ),
        compiler_params=pltpu.CompilerParams(
            dimension_semantics=("parallel", "parallel")),
    )(x, w1_f, w2_f, w3_f)

    if hw_pad != hw:
        y = y[:, :, :hw]
    return y.reshape(n, c_out, h, w)


def _reference(latents, w1, w2, w3):
    # Pure-jnp reference of WeightDist.forward (for correctness check).
    x = latents.astype(jnp.float32)
    h1 = jax.nn.relu(jnp.einsum("oc,nchw->nohw", w1, x))
    h2 = jax.nn.relu(jnp.einsum("oc,nchw->nohw", w2, h1))
    return jnp.tanh(jnp.einsum("oc,nchw->nohw", w3, h2))


def init_params(key, in_channels, de_hidden, hidden, out_channels):
    # Conv2d 1x1, no bias: weight (C_out, C_in) (kernel dims squeezed).
    c_out = (hidden + 1) * out_channels + 1
    k1, k2, k3 = jax.random.split(key, 3)
    w1 = jax.random.normal(k1, (de_hidden, in_channels), jnp.float32) * 0.1
    w2 = jax.random.normal(k2, (de_hidden, de_hidden), jnp.float32) * 0.1
    w3 = jax.random.normal(k3, (c_out, de_hidden), jnp.float32) * 0.1
    return w1, w2, w3


if __name__ == "__main__":
    # Small shapes consistent with the module:
    #   in_channels=8, de_hidden=32, hidden=16, out_channels=4
    #   -> C_out = (16+1)*4 + 1 = 69 ; latents (N=2, 8, 16, 16)
    in_channels, de_hidden, hidden, out_channels = 8, 32, 16, 4
    N, H, W = 2, 16, 16
    c_out = (hidden + 1) * out_channels + 1

    key = jax.random.PRNGKey(0)
    k_x, k_p = jax.random.split(key)
    latents = jax.random.normal(k_x, (N, in_channels, H, W), jnp.float32)
    w1, w2, w3 = init_params(k_p, in_channels, de_hidden, hidden, out_channels)

    out = weight_dist_forward(latents, w1, w2, w3)
    out = jax.block_until_ready(out)

    assert out.shape == (N, c_out, H, W), out.shape

    ref = jax.block_until_ready(_reference(latents, w1, w2, w3))
    assert jnp.allclose(out, ref, atol=1e-5, rtol=1e-5), "mismatch vs reference"

    print("KERNEL_OK")
</pallas_src>

<mosaic_0001>
module attributes {stable_mosaic.version = 11 : i64} {
  func.func @_weightdist_kernel(%arg0: i32, %arg1: i32, %arg2: memref<1x8x256xf32, #tpu.memory_space<vmem>>, %arg3: memref<32x8xf32, #tpu.memory_space<vmem>>, %arg4: memref<32x32xf32, #tpu.memory_space<vmem>>, %arg5: memref<69x32xf32, #tpu.memory_space<vmem>>, %arg6: memref<1x69x256xf32, #tpu.memory_space<vmem>>) attributes {dimension_semantics = [#tpu.dimension_semantics<parallel>, #tpu.dimension_semantics<parallel>], iteration_bounds = array<i64: 2, 1>, scalar_prefetch = 0 : i64, scratch_operands = 0 : i64, tpu.core_type = #tpu.core_type<tc>, window_params = [{transform_indices = @transform_0, window_bounds = array<i64: 1, 8, 256>}, {pipeline_mode = #tpu.pipeline_mode<synchronous>, transform_indices = @transform_1, window_bounds = array<i64: 32, 8>}, {pipeline_mode = #tpu.pipeline_mode<synchronous>, transform_indices = @transform_2, window_bounds = array<i64: 32, 32>}, {pipeline_mode = #tpu.pipeline_mode<synchronous>, transform_indices = @transform_3, window_bounds = array<i64: 69, 32>}, {transform_indices = @transform_4, window_bounds = array<i64: 1, 69, 256>}]} {
    %c0 = arith.constant 0 : index
    %c0_0 = arith.constant 0 : index
    %c0_1 = arith.constant 0 : index
    %0 = vector.load %arg2[%c0, %c0_0, %c0_1] : memref<1x8x256xf32, #tpu.memory_space<vmem>>, vector<1x8x256xf32>
    %1 = vector.shape_cast %0 : vector<1x8x256xf32> to vector<8x256xf32>
    %c0_2 = arith.constant 0 : index
    %c0_3 = arith.constant 0 : index
    %2 = vector.load %arg3[%c0_2, %c0_3] : memref<32x8xf32, #tpu.memory_space<vmem>>, vector<32x8xf32>
    %cst = arith.constant dense<0.000000e+00> : vector<32x256xf32>
    %3 = tpu.matmul %2, %1, %cst {dimension_numbers = #tpu.dot_dimension_numbers<[1], [0], [0], [1], [0, 0, 1, 1], [], []>} : vector<32x8xf32>, vector<8x256xf32>, vector<32x256xf32> -> vector<32x256xf32>
    %cst_4 = arith.constant 0.000000e+00 : f32
    %4 = vector.broadcast %cst_4 : f32 to vector<32x256xf32>
    %5 = arith.maximumf %3, %4 : vector<32x256xf32>
    %c0_5 = arith.constant 0 : index
    %c0_6 = arith.constant 0 : index
    %6 = vector.load %arg4[%c0_5, %c0_6] : memref<32x32xf32, #tpu.memory_space<vmem>>, vector<32x32xf32>
    %cst_7 = arith.constant dense<0.000000e+00> : vector<32x256xf32>
    %7 = tpu.matmul %6, %5, %cst_7 {dimension_numbers = #tpu.dot_dimension_numbers<[1], [0], [0], [1], [0, 0, 1, 1], [], []>} : vector<32x32xf32>, vector<32x256xf32>, vector<32x256xf32> -> vector<32x256xf32>
    %cst_8 = arith.constant 0.000000e+00 : f32
    %8 = vector.broadcast %cst_8 : f32 to vector<32x256xf32>
    %9 = arith.maximumf %7, %8 : vector<32x256xf32>
    %c0_9 = arith.constant 0 : index
    %c0_10 = arith.constant 0 : index
    %10 = vector.load %arg5[%c0_9, %c0_10] : memref<69x32xf32, #tpu.memory_space<vmem>>, vector<69x32xf32>
    %cst_11 = arith.constant dense<0.000000e+00> : vector<69x256xf32>
    %11 = tpu.matmul %10, %9, %cst_11 {dimension_numbers = #tpu.dot_dimension_numbers<[1], [0], [0], [1], [0, 0, 1, 1], [], []>} : vector<69x32xf32>, vector<32x256xf32>, vector<69x256xf32> -> vector<69x256xf32>
    %12 = math.tanh %11 : vector<69x256xf32>
    %c0_12 = arith.constant 0 : index
    %c0_13 = arith.constant 0 : index
    %c0_14 = arith.constant 0 : index
    %13 = vector.load %arg6[%c0_12, %c0_13, %c0_14] : memref<1x69x256xf32, #tpu.memory_space<vmem>>, vector<1x69x256xf32>
    %14 = vector.shape_cast %13 : vector<1x69x256xf32> to vector<69x256xf32>
    %15 = vector.shape_cast %12 : vector<69x256xf32> to vector<1x69x256xf32>
    tpu.vector_store %arg6[%c0_12, %c0_13, %c0_14], %15 {strides = array<i32>} : memref<1x69x256xf32, #tpu.memory_space<vmem>>, vector<1x69x256xf32>,
    return
  }
  func.func @transform_0(%arg0: i32, %arg1: i32) -> (i32, i32, i32) {
    %c0_i32 = arith.constant 0 : i32
    %c0_i32_0 = arith.constant 0 : i32
    return %arg0, %c0_i32, %arg1 : i32, i32, i32
  }
  func.func @transform_1(%arg0: i32, %arg1: i32) -> (i32, i32) {
    %c0_i32 = arith.constant 0 : i32
    %c0_i32_0 = arith.constant 0 : i32
    %c0_i32_1 = arith.constant 0 : i32
    return %c0_i32, %c0_i32_0 : i32, i32
  }
  func.func @transform_2(%arg0: i32, %arg1: i32) -> (i32, i32) {
    %c0_i32 = arith.constant 0 : i32
    %c0_i32_0 = arith.constant 0 : i32
    %c0_i32_1 = arith.constant 0 : i32
    return %c0_i32, %c0_i32_0 : i32, i32
  }
  func.func @transform_3(%arg0: i32, %arg1: i32) -> (i32, i32) {
    %c0_i32 = arith.constant 0 : i32
    %c0_i32_0 = arith.constant 0 : i32
    %c0_i32_1 = arith.constant 0 : i32
    return %c0_i32, %c0_i32_0 : i32, i32
  }
  func.func @transform_4(%arg0: i32, %arg1: i32) -> (i32, i32, i32) {
    %c0_i32 = arith.constant 0 : i32
    %c0_i32_0 = arith.constant 0 : i32
    return %arg0, %c0_i32, %arg1 : i32, i32, i32
  }
}

</mosaic_0001>

<bundles_post_ra>
// kernel: tpu_custom_call.1
= control target key start
LH: loop header
LB: loop body
LE: loop exit
PB: predicated region body
PF: predicated region fallthrough
CT: control target
= control target key end

     0   :  { %s815_s15 = smov 0   ;;  %s817_s16 = smov 0   ;;  %s949_s0 = inlined_call_operand.vmem [shape: f32[2,8,256], index: 0, kind: input, shape index: {}]   ;;  %s950_s1 = inlined_call_operand.vmem [shape: f32[32,8], index: 1, kind: input, shape index: {}]   ;;  %s951_s2 = inlined_call_operand.vmem [shape: f32[32,32], index: 2, kind: input, shape index: {}]   ;;  %s952_s3 = inlined_call_operand.vmem [shape: f32[69,32], index: 3, kind: input, shape index: {}]   ;;  %s953_s4 = inlined_call_operand.vmem [shape: f32[2,69,256], index: 4, kind: output, shape index: {}]  }
   0x1   :  { %s819_s17 = smov 0  }
   0x2 LB: > { %s26_s18 = sadd.s32 1, %s784_s16  ;;  %p656_p0 = scmp.ge.s32.totalorder %s788_s17, 1  ;;  %s788_s17 = sphi %s819_s17, %s14_s17   ;;  %s784_s16 = sphi %s817_s16, %s955_s16   ;;  %s780_s15 = sphi %s815_s15, %s954_s15  }
   0x3   : > { %p28_p1 = scmp.ge.s32.totalorder %s26_s18, 2  ;;  %p183_p2 = scmp.lt.s32.totalorder %s788_s17, 3 }
   0x5   : > { %s957_s18 = smov (%p28_p1, %s26_s18), 0  ;;  %p184_p3 = pnand %p656_p0, %p183_p2 }
   0x6   : > { %p218_p4 = scmp.lt.s32.totalorder (!%p184_p3), %s780_s15, 1 }
   0x7   : > { %187 = sbr.rel (%p184_p3) target bundleno = 511 (0x1ff), region = 36 }
   0xc   : > { %s959_s15 = smov (!%p218_p4, %s780_s15), 1  ;;  %v239_v0 = vld [vmem:[%s950_s1] sm:$0xff]  ;;  %vm243_vm0 = vcmask 64512   ;;  %v240_v3 = vld [vmem:[%s950_s1 + $0x8] sm:$0xff]  ;;  %v241_v4 = vld [vmem:[%s950_s1 + $0x10] sm:$0xff]  ;;  %vm326_vm1 = vcmask 261120  }
   0xd   : > { %s696_s19 = sshll.u32 %s959_s15, 4  ;;  %v242_v5 = vld [vmem:[%s950_s1 + $0x18] sm:$0xff]  ;;  %v322_v22 = vld [vmem:[%s951_s2] sm:$0xff]  ;;  %v323_v23 = vld [vmem:[%s951_s2 + $0x8] sm:$0xff]  ;;  %s705_s9 = smul.u32 144, %s959_s15 }
   0xe   : > { %s225_s22 = scalar_lea.vmem %s949_s0, %s696_s19  ;;  %v324_v24 = vld [vmem:[%s951_s2 + $0x10] sm:$0xff]  ;;  %v325_v25 = vld [vmem:[%s951_s2 + $0x18] sm:$0xff]  ;;  %v405_v42 = vld [vmem:[%s952_s3] sm:$0xff] }
   0xf   : > { %v237_v1 = vld [vmem:[%s225_s22] sm:$0xff]  ;;  %v238_v2 = vld [vmem:[%s225_s22 + $0x8] sm:$0xff]  ;;  %v411_v45 = vld [vmem:[%s952_s3 + $0x30] sm:$0xff]  ;;  %s920_s12 = scalar_lea.vmem %s953_s4, %s705_s9 }
  0x10   : > { %271 = vmatpush.msra.mxu0 %v237_v1  ;;  %300 = vmatpush.msra.mxu1 %v238_v2  ;;  %v410_v43 = vld [vmem:[%s952_s3 + $0x28] sm:$0xff]  ;;  %v407_v46 = vld [vmem:[%s952_s3 + $0x10] sm:$0xff]  ;;  %v412_v47 = vld [vmem:[%s952_s3 + $0x38] sm:$0xff] }
  0x11   : > { %660 = vmatmul.msk.f32.vlgmr.msra.gmra.mxu0 %vm243_vm0, %v239_v0  ;;  %664 = vmatmul.msk.f32.vlgmr.msra.gmra.mxu1 %vm243_vm0, %v239_v0  ;;  %v406_v44 = vld [vmem:[%s952_s3 + $0x8] sm:$0xff]  ;;  %v408_v48 = vld [vmem:[%s952_s3 + $0x18] sm:$0xff]  ;;  %v413_v49 = vld [vmem:[%s952_s3 + $0x40] sm:$0x1f] }
  0x12   : > { %v409_v50 = vld [vmem:[%s952_s3 + $0x20] sm:$0xff] }
  0x19   : > { %661 = vmatmul.msk.f32.gmra.mxu0 %vm243_vm0, %v240_v3  ;;  %665 = vmatmul.msk.f32.gmra.mxu1 %vm243_vm0, %v240_v3 }
  0x21   : > { %662 = vmatmul.msk.f32.gmra.mxu0 %vm243_vm0, %v241_v4  ;;  %666 = vmatmul.msk.f32.gmra.mxu1 %vm243_vm0, %v241_v4 }
  0x29   : > { %663 = vmatmul.msk.f32.gmra.mxu0 %vm243_vm0, %v242_v5  ;;  %667 = vmatmul.msk.f32.gmra.mxu1 %vm243_vm0, %v242_v5 }
  0x8e   : > { %v273_v6 = vpop.f32.mrf.mxu0  ;;  %v302_v7 = vpop.f32.mrf.mxu1 }
  0x8f   : > { %v314_v20 = vmax.f32 %v273_v6, 0.0  ;;  %v315_v21 = vmax.f32 %v302_v7, 0.0 }
  0x96   : > { %v276_v8 = vpop.f32.mrf.mxu0  ;;  %v305_v9 = vpop.f32.mrf.mxu1 }
  0x97   : > { %v316_v18 = vmax.f32 %v276_v8, 0.0  ;;  %v317_v19 = vmax.f32 %v305_v9, 0.0 }
  0x9e   : > { %v279_v10 = vpop.f32.mrf.mxu0  ;;  %v308_v11 = vpop.f32.mrf.mxu1 }
  0x9f   : > { %v318_v16 = vmax.f32 %v279_v10, 0.0  ;;  %v319_v17 = vmax.f32 %v308_v11, 0.0 }
  0xa6   : > { %v282_v12 = vpop.f32.mrf.mxu0  ;;  %v311_v13 = vpop.f32.mrf.mxu1 }
  0xa7   : > { %v320_v14 = vmax.f32 %v282_v12, 0.0  ;;  %v321_v15 = vmax.f32 %v311_v13, 0.0 }
  0xa9   : > { %351 = vmatpush.msra.mxu2 %v320_v14  ;;  %380 = vmatpush.msra.mxu3 %v321_v15 }
  0xab   : > { %352 = vmatpush.msra.mxu2 %v318_v16  ;;  %381 = vmatpush.msra.mxu3 %v319_v17 }
  0xad   : > { %353 = vmatpush.msra.mxu2 %v316_v18  ;;  %382 = vmatpush.msra.mxu3 %v317_v19 }
  0xaf   : > { %354 = vmatpush.msra.mxu2 %v314_v20  ;;  %383 = vmatpush.msra.mxu3 %v315_v21 }
  0xb0   : > { %668 = vmatmul.msk.f32.vlgmr.msra.gmra.mxu2 %vm326_vm1, %v322_v22  ;;  %672 = vmatmul.msk.f32.vlgmr.msra.gmra.mxu3 %vm326_vm1, %v322_v22 }
  0xb8   : > { %669 = vmatmul.msk.f32.gmra.mxu2 %vm326_vm1, %v323_v23  ;;  %673 = vmatmul.msk.f32.gmra.mxu3 %vm326_vm1, %v323_v23 }
  0xc0   : > { %670 = vmatmul.msk.f32.gmra.mxu2 %vm326_vm1, %v324_v24  ;;  %674 = vmatmul.msk.f32.gmra.mxu3 %vm326_vm1, %v324_v24 }
  0xc8   : > { %671 = vmatmul.msk.f32.gmra.mxu2 %vm326_vm1, %v325_v25  ;;  %675 = vmatmul.msk.f32.gmra.mxu3 %vm326_vm1, %v325_v25 }
 0x133   : > { %v356_v26 = vpop.f32.mrf.mxu2  ;;  %v385_v27 = vpop.f32.mrf.mxu3 }
 0x134   : > { %v397_v40 = vmax.f32 %v356_v26, 0.0  ;;  %v398_v41 = vmax.f32 %v385_v27, 0.0 }
 0x13b   : > { %v359_v28 = vpop.f32.mrf.mxu2  ;;  %v388_v29 = vpop.f32.mrf.mxu3 }
 0x13c   : > { %v399_v38 = vmax.f32 %v359_v28, 0.0  ;;  %v400_v39 = vmax.f32 %v388_v29, 0.0 }
 0x143   : > { %v362_v30 = vpop.f32.mrf.mxu2  ;;  %v391_v31 = vpop.f32.mrf.mxu3 }
 0x144   : > { %v401_v36 = vmax.f32 %v362_v30, 0.0  ;;  %v402_v37 = vmax.f32 %v391_v31, 0.0 }
 0x14b   : > { %v365_v32 = vpop.f32.mrf.mxu2  ;;  %v394_v33 = vpop.f32.mrf.mxu3 }
 0x14c   : > { %v403_v34 = vmax.f32 %v365_v32, 0.0  ;;  %v404_v35 = vmax.f32 %v394_v33, 0.0 }
 0x14e   : > { %453 = vmatpush.msrb.mxu0 %v403_v34  ;;  %697 = vmatpush.msrb.mxu2 %v403_v34 }
 0x14f   : > { %497 = vmatpush.msrb.mxu1 %v404_v35  ;;  %701 = vmatpush.msrb.mxu3 %v404_v35 }
 0x150   : > { %454 = vmatpush.msrb.mxu0 %v401_v36  ;;  %698 = vmatpush.msrb.mxu2 %v401_v36 }
 0x151   : > { %498 = vmatpush.msrb.mxu1 %v402_v37  ;;  %702 = vmatpush.msrb.mxu3 %v402_v37 }
 0x152   : > { %455 = vmatpush.msrb.mxu0 %v399_v38  ;;  %699 = vmatpush.msrb.mxu2 %v399_v38 }
 0x153   : > { %499 = vmatpush.msrb.mxu1 %v400_v39  ;;  %703 = vmatpush.msrb.mxu3 %v400_v39 }
 0x154   : > { %456 = vmatpush.msrb.mxu0 %v397_v40  ;;  %700 = vmatpush.msrb.mxu2 %v397_v40 }
 0x155   : > { %500 = vmatpush.msrb.mxu1 %v398_v41  ;;  %704 = vmatpush.msrb.mxu3 %v398_v41 }
 0x156   : > { %676 = vmatmul.msk.f32.vlgmr.msrb.gmra.mxu0 %vm326_vm1, %v405_v42  ;;  %685 = vmatmul.msk.f32.vlgmr.msrb.gmra.mxu1 %vm326_vm1, %v405_v42 }
 0x157   : > { %681 = vmatmul.msk.f32.vlgmr.msrb.gmra.mxu2 %vm326_vm1, %v410_v43  ;;  %690 = vmatmul.msk.f32.vlgmr.msrb.gmra.mxu3 %vm326_vm1, %v410_v43 }
 0x15e   : > { %677 = vmatmul.msk.f32.gmra.mxu0 %vm326_vm1, %v406_v44  ;;  %686 = vmatmul.msk.f32.gmra.mxu1 %vm326_vm1, %v406_v44 }
 0x15f   : > { %682 = vmatmul.msk.f32.gmra.mxu2 %vm326_vm1, %v411_v45  ;;  %691 = vmatmul.msk.f32.gmra.mxu3 %vm326_vm1, %v411_v45 }
 0x166   : > { %678 = vmatmul.msk.f32.gmra.mxu0 %vm326_vm1, %v407_v46  ;;  %687 = vmatmul.msk.f32.gmra.mxu1 %vm326_vm1, %v407_v46 }
 0x167   : > { %683 = vmatmul.msk.f32.gmra.mxu2 %vm326_vm1, %v412_v47  ;;  %692 = vmatmul.msk.f32.gmra.mxu3 %vm326_vm1, %v412_v47 }
 0x16e   : > { %679 = vmatmul.msk.f32.gmra.mxu0 %vm326_vm1, %v408_v48  ;;  %688 = vmatmul.msk.f32.gmra.mxu1 %vm326_vm1, %v408_v48 }
 0x16f   : > { %684 = vmatmul.msk.f32.gmra.mxu2 %vm326_vm1, %v413_v49  ;;  %693 = vmatmul.msk.f32.gmra.mxu3 %vm326_vm1, %v413_v49 }
 0x176   : > { %680 = vmatmul.msk.f32.gmra.mxu0 %vm326_vm1, %v409_v50  ;;  %689 = vmatmul.msk.f32.gmra.mxu1 %vm326_vm1, %v409_v50 }
 0x1d3   : > { %v458_v51 = vpop.f32.mrf.mxu0  ;;  %v502_v52 = vpop.f32.mrf.mxu1 }
 0x1d4   : > { %730 = vtanh.f32 %v458_v51 }
 0x1d5   : > { %732 = vtanh.f32 %v502_v52 }
 0x1da   : > { %v731_v53 = vpop.eup %730  ;;  %v473_v54 = vpop.f32.mrf.mxu2 }
 0x1db   : > { %v517_v55 = vpop.f32.mrf.mxu3  ;;  %v733_v56 = vpop.eup %732  ;;  %547 = vst [vmem:[%s920_s12] sm:$0xff] %v731_v53  ;;  %734 = vtanh.f32 %v473_v54 }
 0x1dc   : > { %v461_v57 = vpop.f32.mrf.mxu0  ;;  %v505_v58 = vpop.f32.mrf.mxu1  ;;  %548 = vst [vmem:[%s920_s12 + $0x8] sm:$0xff] %v733_v56 }
 0x1dd   : > { %736 = vtanh.f32 %v461_v57 }
 0x1de   : > { %738 = vtanh.f32 %v505_v58 }
 0x1df   : > { %740 = vtanh.f32 %v517_v55 }
 0x1e1   : > { %v735_v59 = vpop.eup %734 }
 0x1e2   : > { %557 = vst [vmem:[%s920_s12 + $0x50] sm:$0xff] %v735_v59  ;;  %v476_v61 = vpop.f32.mrf.mxu2 }
 0x1e3   : > { %v737_v60 = vpop.eup %736  ;;  %v520_v62 = vpop.f32.mrf.mxu3  ;;  %742 = vtanh.f32 %v476_v61 }
 0x1e4   : > { %v739_v63 = vpop.eup %738  ;;  %549 = vst [vmem:[%s920_s12 + $0x10] sm:$0xff] %v737_v60  ;;  %v464_v0 = vpop.f32.mrf.mxu0 }
 0x1e5   : > { %v508_v1 = vpop.f32.mrf.mxu1  ;;  %v741_v2 = vpop.eup %740  ;;  %550 = vst [vmem:[%s920_s12 + $0x18] sm:$0xff] %v739_v63  ;;  %744 = vtanh.f32 %v464_v0 }
 0x1e6   : > { %558 = vst [vmem:[%s920_s12 + $0x58] sm:$0xff] %v741_v2  ;;  %746 = vtanh.f32 %v508_v1 }
 0x1e7   : > { %748 = vtanh.f32 %v520_v62 }
 0x1e9   : > { %v743_v3 = vpop.eup %742 }
 0x1ea   : > { %559 = vst [vmem:[%s920_s12 + $0x60] sm:$0xff] %v743_v3  ;;  %v479_v5 = vpop.f32.mrf.mxu2 }
 0x1eb   : > { %v745_v4 = vpop.eup %744  ;;  %v523_v6 = vpop.f32.mrf.mxu3  ;;  %750 = vtanh.f32 %v479_v5 }
 0x1ec   : > { %v747_v7 = vpop.eup %746  ;;  %551 = vst [vmem:[%s920_s12 + $0x20] sm:$0xff] %v745_v4  ;;  %v467_v8 = vpop.f32.mrf.mxu0 }
 0x1ed   : > { %v511_v9 = vpop.f32.mrf.mxu1  ;;  %v749_v10 = vpop.eup %748  ;;  %552 = vst [vmem:[%s920_s12 + $0x28] sm:$0xff] %v747_v7  ;;  %752 = vtanh.f32 %v467_v8 }
 0x1ee   : > { %560 = vst [vmem:[%s920_s12 + $0x68] sm:$0xff] %v749_v10  ;;  %754 = vtanh.f32 %v511_v9 }
 0x1ef   : > { %756 = vtanh.f32 %v523_v6 }
 0x1f1   : > { %v751_v11 = vpop.eup %750 }
 0x1f2   : > { %561 = vst [vmem:[%s920_s12 + $0x70] sm:$0xff] %v751_v11  ;;  %v482_v13 = vpop.f32.mrf.mxu2 }
 0x1f3   : > { %v753_v12 = vpop.eup %752  ;;  %v526_v14 = vpop.f32.mrf.mxu3  ;;  %758 = vtanh.f32 %v482_v13 }
 0x1f4   : > { %v755_v15 = vpop.eup %754  ;;  %553 = vst [vmem:[%s920_s12 + $0x30] sm:$0xff] %v753_v12  ;;  %v470_v16 = vpop.f32.mrf.mxu0 }
 0x1f5   : > { %v514_v17 = vpop.f32.mrf.mxu1  ;;  %v757_v18 = vpop.eup %756  ;;  %554 = vst [vmem:[%s920_s12 + $0x38] sm:$0xff] %v755_v15  ;;  %760 = vtanh.f32 %v470_v16 }
 0x1f6   : > { %562 = vst [vmem:[%s920_s12 + $0x78] sm:$0xff] %v757_v18  ;;  %762 = vtanh.f32 %v514_v17 }
 0x1f7   : > { %764 = vtanh.f32 %v526_v14 }
 0x1f9   : > { %v759_v19 = vpop.eup %758 }
 0x1fa   : > { %563 = vst [vmem:[%s920_s12 + $0x80] sm:$0x1f] %v759_v19 }
 0x1fb   : > { %v761_v20 = vpop.eup %760 }
 0x1fc   : > { %v763_v21 = vpop.eup %762  ;;  %555 = vst [vmem:[%s920_s12 + $0x40] sm:$0xff] %v761_v20 }
 0x1fd   : > { %v765_v22 = vpop.eup %764  ;;  %556 = vst [vmem:[%s920_s12 + $0x48] sm:$0xff] %v763_v21 }
 0x1fe   : > { %564 = vst [vmem:[%s920_s12 + $0x88] sm:$0x1f] %v765_v22 }
 0x1ff PF: > { %s14_s17 = sadd.s32 1, %s788_s17   ;;  %s954_s15 = smov %s784_s16 }
 0x200   : > { %p11_p5 = scmp.ge.s32.totalorder %s14_s17, 4   ;;  %s955_s16 = smov %s957_s18 }
 0x202   :  { %13 = sbr.rel (!%p11_p5) target bundleno = 2 (0x2), region = 66 }

</bundles_post_ra>
